<compile_context>
chip_gen: v5e
topology: v5e:2x2
jax: 0.10.0
libtpu: 0.0.40
codegen_flags: <defaults>
</compile_context>

<pallas_src>
import jax
import jax.numpy as jnp
from jax.experimental import pallas as pl
from jax.experimental.pallas import tpu as pltpu


def build_positional_encodings(max_len: int, embed_dim: int) -> jnp.ndarray:
    """Exactly mirrors PositionalEncoding._build_positional_encodings (f32 table)."""
    assert embed_dim % 2 == 0, "embed_dim must be even (same limitation as the PyTorch module)"
    pos = jnp.arange(0, max_len, dtype=jnp.float32).reshape(-1, 1)        # (L, 1)
    skip = jnp.arange(0, embed_dim, 2, dtype=jnp.float32)                 # (D/2,)
    angles = pos / (10000.0 ** (skip / embed_dim))                        # (L, D/2)
    enc = jnp.zeros((max_len, embed_dim), dtype=jnp.float32)
    enc = enc.at[:, 0::2].set(jnp.sin(angles))
    enc = enc.at[:, 1::2].set(jnp.cos(angles))
    return enc


def _add_enc_kernel(x_ref, enc_ref, o_ref):
    # x_ref / o_ref: (TB, TS, D) tiles; enc_ref: (1, TS, D) tile of the same dtype.
    # Leading-dim broadcast == repeated lane-dense VPU adds; memory-bound, compute free.
    o_ref[...] = x_ref[...] + enc_ref[...]


# Conservative VMEM sizing, valid across v5e / v6e / v7x.
_VMEM_TILE_BUDGET = 24 * 1024 * 1024   # bytes for double-buffered x/out/enc tiles
_VMEM_LIMIT_BYTES = 48 * 1024 * 1024   # scoped limit: headroom under v7x's 64 MiB


def _choose_tiles(B: int, S: int, D: int, itemsize: int):
    """Pick (seq_tile, batch_tile) so 2x(x)+2x(out)+2x(enc) tiles fit the VMEM budget."""
    base = max(8, 32 // itemsize)          # 8 rows f32, 16 rows bf16, 32 rows int8

    def fits(ts, tb):
        # per-step bytes: 2 x-bufs + 2 out-bufs of (tb, ts, D), 2 enc-bufs of (1, ts, D)
        return itemsize * ts * D * (4 * tb + 2) <= _VMEM_TILE_BUDGET

    # --- sequence tile ---
    if fits(S, 1) or S % base != 0:
        # Whole sequence per step (block == full dim is always layout-legal), or S
        # cannot be tiled on sublane boundaries so the full dim is required anyway.
        ts = S
    else:
        max_rows = _VMEM_TILE_BUDGET // (itemsize * D * 6)
        ts = max(base, (min(S, max_rows) // base) * base)
        while S % ts != 0:                 # terminates: base divides S here
            ts -= base
    n_s = S // ts

    # --- batch tile: only >1 when the whole sequence already fits in one tile ---
    tb = 1
    if n_s == 1:
        tb_cap = max(1, (_VMEM_TILE_BUDGET // (itemsize * ts * D) - 2) // 4)
        tb = min(B, tb_cap)
        while B % tb != 0:
            tb -= 1
    return ts, tb


def positional_encoding_forward(x: jnp.ndarray, encodings: jnp.ndarray) -> jnp.ndarray:
    """x: (B, S, D); encodings: (max_len, D) f32.  Returns x + encodings[:S]."""
    B, S, D = x.shape
    # Static slice of the parameter table + pre-cast to x.dtype (no in-kernel promote).
    enc = encodings[:S].astype(x.dtype).reshape(1, S, D)

    ts, tb = _choose_tiles(B, S, D, x.dtype.itemsize)
    n_s, n_b = S // ts, B // tb

    return pl.pallas_call(
        _add_enc_kernel,
        out_shape=jax.ShapeDtypeStruct((B, S, D), x.dtype),
        grid_spec=pltpu.PrefetchScalarGridSpec(
            num_scalar_prefetch=0,
            # seq-tile axis outer, batch inner: the enc block index is constant across
            # the inner batch loop, so its DMA is not re-issued.
            grid=(n_s, n_b),
            in_specs=[
                pl.BlockSpec((tb, ts, D), lambda s, b: (b, s, 0)),
                pl.BlockSpec((1, ts, D), lambda s, b: (0, s, 0)),
            ],
            out_specs=pl.BlockSpec((tb, ts, D), lambda s, b: (b, s, 0)),
        ),
        compiler_params=pltpu.CompilerParams(
            dimension_semantics=("parallel", "parallel"),
            vmem_limit_bytes=_VMEM_LIMIT_BYTES,
        ),
    )(x, enc)


if __name__ == "__main__":
    max_len = 16
    embed_dim = 32
    batch = 2
    seq_len = 8

    encodings = build_positional_encodings(max_len, embed_dim)

    key = jax.random.PRNGKey(0)
    x = jax.random.normal(key, (batch, seq_len, embed_dim), dtype=jnp.float32)

    # Plain-JAX reference.
    ref = x + encodings[:seq_len][None, :, :]

    out = positional_encoding_forward(x, encodings)
    out = jax.block_until_ready(out)

    assert out.shape == x.shape
    assert jnp.allclose(out, ref, atol=1e-6), "mismatch vs reference"

    print("KERNEL_OK")
</pallas_src>

<mosaic_0001>
module attributes {stable_mosaic.version = 11 : i64} {
  func.func @_add_enc_kernel(%arg0: i32, %arg1: i32, %arg2: memref<2x8x32xf32, #tpu.memory_space<vmem>>, %arg3: memref<1x8x32xf32, #tpu.memory_space<vmem>>, %arg4: memref<2x8x32xf32, #tpu.memory_space<vmem>>) attributes {dimension_semantics = [#tpu.dimension_semantics<parallel>, #tpu.dimension_semantics<parallel>], iteration_bounds = array<i64: 1, 1>, scalar_prefetch = 0 : i64, scratch_operands = 0 : i64, tpu.core_type = #tpu.core_type<tc>, window_params = [{transform_indices = @transform_0, window_bounds = array<i64: 2, 8, 32>}, {transform_indices = @transform_1, window_bounds = array<i64: 1, 8, 32>}, {transform_indices = @transform_2, window_bounds = array<i64: 2, 8, 32>}]} {
    %c0 = arith.constant 0 : index
    %c0_0 = arith.constant 0 : index
    %c0_1 = arith.constant 0 : index
    %0 = vector.load %arg2[%c0, %c0_0, %c0_1] : memref<2x8x32xf32, #tpu.memory_space<vmem>>, vector<2x8x32xf32>
    %c0_2 = arith.constant 0 : index
    %c0_3 = arith.constant 0 : index
    %c0_4 = arith.constant 0 : index
    %1 = vector.load %arg3[%c0_2, %c0_3, %c0_4] : memref<1x8x32xf32, #tpu.memory_space<vmem>>, vector<1x8x32xf32>
    %2 = vector.broadcast %1 : vector<1x8x32xf32> to vector<2x8x32xf32>
    %3 = arith.addf %0, %2 : vector<2x8x32xf32>
    %c0_5 = arith.constant 0 : index
    %c0_6 = arith.constant 0 : index
    %c0_7 = arith.constant 0 : index
    %4 = vector.load %arg4[%c0_5, %c0_6, %c0_7] : memref<2x8x32xf32, #tpu.memory_space<vmem>>, vector<2x8x32xf32>
    tpu.vector_store %arg4[%c0_5, %c0_6, %c0_7], %3 {strides = array<i32>} : memref<2x8x32xf32, #tpu.memory_space<vmem>>, vector<2x8x32xf32>,
    return
  }
  func.func @transform_0(%arg0: i32, %arg1: i32) -> (i32, i32, i32) {
    %c0_i32 = arith.constant 0 : i32
    %c0_i32_0 = arith.constant 0 : i32
    return %arg1, %arg0, %c0_i32 : i32, i32, i32
  }
  func.func @transform_1(%arg0: i32, %arg1: i32) -> (i32, i32, i32) {
    %c0_i32 = arith.constant 0 : i32
    %c0_i32_0 = arith.constant 0 : i32
    %c0_i32_1 = arith.constant 0 : i32
    return %c0_i32, %arg0, %c0_i32_0 : i32, i32, i32
  }
  func.func @transform_2(%arg0: i32, %arg1: i32) -> (i32, i32, i32) {
    %c0_i32 = arith.constant 0 : i32
    %c0_i32_0 = arith.constant 0 : i32
    return %arg1, %arg0, %c0_i32 : i32, i32, i32
  }
}

</mosaic_0001>

<bundles_post_ra>
// kernel: tpu_custom_call.1
= control target key start
LH: loop header
LB: loop body
LE: loop exit
PB: predicated region body
PF: predicated region fallthrough
CT: control target
= control target key end

     0   :  { %7 = vsyncpa [#allocation3], 0  ;;  %s182_s0 = inlined_call_operand.hbm [shape: f32[2,8,32], index: 0, kind: input, shape index: {}]   ;;  %s183_s1 = inlined_call_operand.hbm [shape: f32[1,8,32], index: 1, kind: input, shape index: {}]   ;;  %s184_s2 = inlined_call_operand.hbm [shape: f32[2,8,32], index: 2, kind: output, shape index: {}]  }
   0x1   :  { %8 = vsyncpa [#allocation6], 0 }
   0x2   :  { %9 = vsyncpa [#allocation4], 0  ;;  %s14_s11 = sshll.u32 %s182_s0, 4  ;;  %s153_s12 = smov [#allocation2]   ;;  %s15_s11 = int_to_ptr.hbm [resolvable:$true] %s14_s11 }
   0x3   :  { %s16_s13 = sshll.u32 %s153_s12, 4  ;;  %s28_s16 = sshll.u32 %s183_s1, 4  ;;  %s17_s13 = int_to_ptr.vmem [resolvable:$true] %s16_s13  ;;  %s29_s16 = int_to_ptr.hbm [resolvable:$true] %s28_s16 }
   0x4   :  { %s154_s17 = smov 128   ;;  %s155_s18 = smov 8  }
   0x5   :  { %22 = dma.hbm_to_vmem [thread:$0]  %s15_s11, 256, %s17_s13, [#allocation3], %s154_s17, %s154_s17, %s155_s18  }
   0x6   :  { %s156_s19 = smov [#allocation5]  }
   0x7   :  { %s30_s20 = sshll.u32 %s156_s19, 4  ;;  %s31_s20 = int_to_ptr.vmem [resolvable:$true] %s30_s20 }
   0x8   :  { %33 = dma.hbm_to_vmem [thread:$0]  %s29_s16, 128, %s31_s20, [#allocation6]  }
   0x9   :  { %147 = dma.done.wait [#allocation3], 256  }
   0xa   :  { %148 = vsyncadd [#allocation3], 4294967040 }
   0xb   :  { %149 = dma.done.wait [#allocation6], 128  }
   0xc   :  { %150 = vsyncadd [#allocation6], 4294967168  ;;  %s157_s0 = smov [#allocation7]   ;;  %s56_s24 = sshll.u32 %s184_s2, 4  ;;  %v42_v0 = vld [vmem:[#allocation2] sm:$0xff]  ;;  %v44_v1 = vld [vmem:[#allocation5] sm:$0xff]  ;;  %s57_s24 = int_to_ptr.hbm [resolvable:$true] %s56_s24 }
   0xd   :  { %s54_s21 = sshll.u32 %s157_s0, 4  ;;  %vm47_vm0 = vcmask 261120   ;;  %v43_v2 = vld [vmem:[#allocation2 + $0x8] sm:$0xff]  ;;  %v45_v3 = vadd.f32 %v44_v1, %v42_v0  ;;  %s55_s21 = int_to_ptr.vmem [resolvable:$true] %s54_s21 }
   0xe   :  { %v46_v4 = vadd.f32 %v44_v1, %v43_v2 }
   0xf   :  { %48 = vst.msk [vmem:[#allocation7] sm:$0xff] %vm47_vm0, %v45_v3 }
  0x10   :  { %49 = vst.msk [vmem:[#allocation7 + $0x8] sm:$0xff] %vm47_vm0, %v46_v4 }
  0x11   :  { %62 = dma.vmem_to_hbm [thread:$0]  %s55_s21, 256, %s57_s24, [#allocation4], %s154_s17, %s154_s17, %s155_s18  }
  0x12   :  { %151 = dma.done.wait [#allocation4], 256  }
  0x13   :  { %152 = vsyncadd [#allocation4], 4294967040 }
  0x14   :  { %67 = vsyncpa [#allocation3], 1 }
  0x15   :  { %68 = vsyncpa [#allocation6], 1 }
  0x16   :  { %69 = vsyncpa [#allocation4], 1 }

</bundles_post_ra>
